<compile_context>
chip_gen: v7x
topology: tpu7x:2x2x1
jax: 0.10.0
libtpu: 0.0.40
codegen_flags: <defaults>
</compile_context>

<pallas_src>
import functools
import math

import jax
import jax.numpy as jnp
from jax.experimental import pallas as pl
from jax.experimental.pallas import tpu as pltpu


def _round_up(v, m):
    return (v + m - 1) // m * m


def _cdiv(a, b):
    return (a + b - 1) // b


# ----------------------------- Pallas kernels -----------------------------

def _proj_kernel(x_ref, w_ref, b_ref, o_ref):
    # Fused two-stream projection for BOTH heads (key | query) in one matmul:
    #   x @ (w1 + w2) + (b1 + b2); the streams are summed on the host (exact,
    #   both streams are linear), and key/query weights are concatenated
    #   along N so the 128-lane output pad is amortized over both heads.
    o_ref[...] = (jnp.dot(x_ref[...], w_ref[...],
                          preferred_element_type=jnp.float32) + b_ref[...])


def _conv_kernel(a_ref, b_ref, w_ref, o_ref, *, t_oy, ow, cs):
    # Correlation (F.conv2d) without a materialized full im2col.
    #  a_ref : width-im2col rows of output-row tile m      (t_oy*ow, cs*C) bf16
    #  b_ref : width-im2col rows of output-row tile m+1    (halo for row taps)
    #  w_ref : per-row-tap weight matrices                 (cs, cs*C, 128) bf16
    #  o_ref : output tile, lane-dense                     (t_oy*ow, 128)  f32
    # The cs row taps are accumulated in registers with static-sliced MXU
    # matmuls; a single full-tile aligned store at the end.
    rows_blk = t_oy * ow
    ab = jnp.concatenate([a_ref[...], b_ref[...]], axis=0)   # tile + halo
    w = w_ref[...]
    acc = jnp.dot(ab[0:rows_blk, :], w[0],
                  preferred_element_type=jnp.float32)
    for i in range(1, cs):                                   # static unroll
        acc = acc + jnp.dot(ab[i * ow:i * ow + rows_blk, :], w[i],
                            preferred_element_type=jnp.float32)
    o_ref[...] = acc


def _softmax_kernel(x_ref, o_ref):
    # Global softmax over the whole (flattened, -inf padded) block.
    # Exact normalization (matches F.softmax); the approx reciprocal on the
    # EUP is not accurate enough to keep sum(out) == 1 to 1e-3.
    x = x_ref[...]
    m = jnp.max(x, keepdims=True)
    e = jnp.exp(x - m)
    s = jnp.sum(e, keepdims=True)
    o_ref[...] = e / s


# --------------------------- Pallas call wrappers --------------------------

def fused_projection(x2d, w_cat, b_cat, *, tm=256):
    """x2d: (M, Cin) pixels (image pixels and crop pixels stacked along M).
    Returns (M, 128) with out[:, :D] = key head, out[:, D:2D] = query head."""
    M, C = x2d.shape
    N = w_cat.shape[1]
    NP = _round_up(N, 128)                 # lane-dense output width
    tm = min(tm, _round_up(M, 8))
    wp = jnp.zeros((C, NP), jnp.float32).at[:, :N].set(w_cat)
    bp = jnp.zeros((1, NP), jnp.float32).at[:, :N].set(b_cat[None, :])
    return pl.pallas_call(
        _proj_kernel,
        out_shape=jax.ShapeDtypeStruct((M, NP), jnp.float32),
        grid=(_cdiv(M, tm),),              # ragged last tile handled by Pallas
        in_specs=[pl.BlockSpec((tm, C), lambda m: (m, 0)),
                  pl.BlockSpec((C, NP), lambda m: (0, 0)),
                  pl.BlockSpec((1, NP), lambda m: (0, 0))],
        out_specs=pl.BlockSpec((tm, NP), lambda m: (m, 0)),
        compiler_params=pltpu.CompilerParams(
            dimension_semantics=("parallel",)),   # megacore
    )(x2d, wp, bp)


def conv_correlate(logits_hwc, kern_hwc, pad, cs):
    """F.conv2d(logits[1,D,Hp,Wp], kern[R,D,cs,cs], padding=pad) as a tiled
    Pallas kernel.  logits_hwc: (Hp, Wp, D); kern_hwc: (R, cs, cs, D).
    Returns (R, OH, OW) f32."""
    Hp, Wp, D = logits_hwc.shape
    R = kern_hwc.shape[0]
    assert kern_hwc.shape[3] == D
    OH = Hp + 2 * pad - cs + 1
    OW = Wp + 2 * pad - cs + 1
    KC = cs * D
    RP = _round_up(R, 128)

    # Row-tile size: multiple of 8 and >= cs so the single halo block suffices.
    t_oy = _round_up(max(cs, 8), 8)
    num_m = _cdiv(OH, t_oy)
    h_rows = (num_m + 1) * t_oy            # extra zero rows: halo of last tile

    # conv padding + extra bottom rows, then width-only im2col (x cs, bf16)
    lg = jnp.pad(logits_hwc, ((pad, h_rows - Hp - pad), (pad, pad), (0, 0)))
    wide = jnp.stack([lg[:, j:j + OW, :] for j in range(cs)], axis=2)
    wide = wide.reshape(h_rows, OW, KC).astype(jnp.bfloat16)
    wide = wide.reshape(h_rows * OW, KC)

    # per-row-tap weights: w_taps[i, j*D + d, r] = kern[r, d, i, j]
    wt = kern_hwc.transpose(1, 2, 3, 0).reshape(cs, KC, R)
    wt = jnp.zeros((cs, KC, RP), jnp.bfloat16).at[:, :, :R].set(
        wt.astype(jnp.bfloat16))

    rows_blk = t_oy * OW
    kern_fn = functools.partial(_conv_kernel, t_oy=t_oy, ow=OW, cs=cs)
    out = pl.pallas_call(
        kern_fn,
        out_shape=jax.ShapeDtypeStruct((num_m * rows_blk, RP), jnp.float32),
        grid=(num_m,),
        in_specs=[pl.BlockSpec((rows_blk, KC), lambda m: (m, 0)),
                  pl.BlockSpec((rows_blk, KC), lambda m: (m + 1, 0)),
                  pl.BlockSpec((cs, KC, RP), lambda m: (0, 0, 0))],
        out_specs=pl.BlockSpec((rows_blk, RP), lambda m: (m, 0)),
        compiler_params=pltpu.CompilerParams(
            dimension_semantics=("parallel",),
            vmem_limit_bytes=48 * 1024 * 1024),
    )(wide, wide, wt)

    corr = out[:OH * OW, :R].reshape(OH, OW, R).transpose(2, 0, 1)
    return corr


def pallas_global_softmax(v):
    """softmax over a flat vector (matches F.softmax over all elements)."""
    n = v.shape[0]
    npad = _round_up(n, 8 * 128)
    vp = jnp.full((npad,), -jnp.inf, jnp.float32).at[:n].set(v)
    vp = vp.reshape(npad // 128, 128)
    out = pl.pallas_call(
        _softmax_kernel,
        out_shape=jax.ShapeDtypeStruct(vp.shape, jnp.float32),
        grid=(1,),
        in_specs=[pl.BlockSpec(vp.shape, lambda i: (0, 0))],
        out_specs=pl.BlockSpec(vp.shape, lambda i: (0, 0)),
    )(vp)
    return out.reshape(-1)[:n]


# ------------------------------- JAX glue ----------------------------------

def _rotate_bilinear(img, angle_deg, pivot_yx):
    """Rotate (H, W, C) image counter-clockwise by angle_deg about pivot
    (row, col), bilinear sampling, zeros outside (kornia-style rotate)."""
    H, W, C = img.shape
    theta = jnp.deg2rad(angle_deg)
    c, s = jnp.cos(theta), jnp.sin(theta)
    py, px = float(pivot_yx[0]), float(pivot_yx[1])
    yy = jnp.arange(H, dtype=jnp.float32)[:, None]
    xx = jnp.arange(W, dtype=jnp.float32)[None, :]
    dy, dx = yy - py, xx - px
    src_y = c * dy + s * dx + py
    src_x = -s * dy + c * dx + px
    y0f, x0f = jnp.floor(src_y), jnp.floor(src_x)
    wy, wx = src_y - y0f, src_x - x0f
    y0, x0 = y0f.astype(jnp.int32), x0f.astype(jnp.int32)

    def sample(yi, xi):
        valid = (yi >= 0) & (yi < H) & (xi >= 0) & (xi < W)
        yc = jnp.clip(yi, 0, H - 1)
        xc = jnp.clip(xi, 0, W - 1)
        return img[yc, xc, :] * valid[..., None].astype(img.dtype)

    v00 = sample(y0, x0)
    v01 = sample(y0, x0 + 1)
    v10 = sample(y0 + 1, x0)
    v11 = sample(y0 + 1, x0 + 1)
    top = v00 * (1.0 - wx)[..., None] + v01 * wx[..., None]
    bot = v10 * (1.0 - wx)[..., None] + v11 * wx[..., None]
    return top * (1.0 - wy)[..., None] + bot * wy[..., None]


def _bilinear_resize(x, out_h, out_w):
    """x: (C, H, W) -> (C, out_h, out_w), matches F.interpolate(bilinear,
    align_corners=False)."""
    C, H, W = x.shape

    def src(out_size, in_size):
        scale = in_size / out_size
        s = (jnp.arange(out_size, dtype=jnp.float32) + 0.5) * scale - 0.5
        s = jnp.clip(s, 0.0, in_size - 1)
        i0 = jnp.floor(s).astype(jnp.int32)
        i1 = jnp.minimum(i0 + 1, in_size - 1)
        return i0, i1, s - i0.astype(jnp.float32)

    y0, y1, fy = src(out_h, H)
    x0, x1, fx = src(out_w, W)
    top = x[:, y0, :] * (1.0 - fy)[None, :, None] + x[:, y1, :] * fy[None, :, None]
    return top[:, :, x0] * (1.0 - fx)[None, None, :] + top[:, :, x1] * fx[None, None, :]


# ------------------------------ module forward ------------------------------

def init_params(key, in_c, output_dim, kernel_dim):
    ks = jax.random.split(key, 8)
    w = lambda k, shape: 0.1 * jax.random.normal(k, shape, jnp.float32)
    return {
        "key_w1": w(ks[0], (in_c, output_dim)), "key_b1": w(ks[1], (output_dim,)),
        "key_w2": w(ks[2], (in_c, output_dim)), "key_b2": w(ks[3], (output_dim,)),
        "qry_w1": w(ks[4], (in_c, kernel_dim)), "qry_b1": w(ks[5], (kernel_dim,)),
        "qry_w2": w(ks[6], (in_c, kernel_dim)), "qry_b2": w(ks[7], (kernel_dim,)),
    }


def two_stream_transport_forward(inp_img, p, params, *, n_rotations, crop_size,
                                 softmax=True):
    """inp_img: (H, W, C) float; p: (row, col) python ints."""
    H, W, C = inp_img.shape
    cs = crop_size
    pad = cs // 2
    hcrop = pad
    x = jnp.pad(inp_img.astype(jnp.float32), ((pad, pad), (pad, pad), (0, 0)))
    Hp, Wp = H + 2 * pad, W + 2 * pad
    pv = (int(p[0]) + pad, int(p[1]) + pad)

    # ---- ImageRotator equivalent: crop-before-rotate (small window only) ----
    margin = int(math.ceil(hcrop * (math.sqrt(2.0) - 1.0))) + 2
    S = cs + 2 * margin
    xm = jnp.pad(x, ((margin, margin), (margin, margin), (0, 0)))
    r0, c0 = pv[0] - hcrop, pv[1] - hcrop          # window start in xm coords
    window = xm[r0:r0 + S, c0:c0 + S, :]
    pw = float(hcrop + margin)                     # pivot in window coords
    angles = jnp.asarray([i * 360.0 / n_rotations for i in range(n_rotations)],
                         jnp.float32)
    rot_all = jax.vmap(lambda a: _rotate_bilinear(window, a, (pw, pw)))(angles)
    crop = rot_all[:, margin:margin + cs, margin:margin + cs, :]   # (R,cs,cs,C)

    # ---- transport(): fused two-stream key + query projections (one call) ----
    D = params["key_w1"].shape[1]
    Dk = params["qry_w1"].shape[1]
    assert D == Dk, "conv correlation requires output_dim == kernel_dim"
    w_cat = jnp.concatenate([params["key_w1"] + params["key_w2"],
                             params["qry_w1"] + params["qry_w2"]], axis=1)
    b_cat = jnp.concatenate([params["key_b1"] + params["key_b2"],
                             params["qry_b1"] + params["qry_b2"]], axis=0)
    X = jnp.concatenate([x.reshape(Hp * Wp, C), crop.reshape(-1, C)], axis=0)
    proj = fused_projection(X, w_cat, b_cat)
    logits_hwc = proj[:Hp * Wp, :D].reshape(Hp, Wp, D)
    kern_hwc = proj[Hp * Wp:, D:D + Dk].reshape(n_rotations, cs, cs, Dk)

    # ---- correlate(): F.conv2d via tiled row-tap accumulation (bf16/MXU) ----
    corr = conv_correlate(logits_hwc, kern_hwc, pad, cs)           # (R,OH,OW)

    # F.interpolate(bilinear) back to (Hp, Wp), then strip the padding
    corr = _bilinear_resize(corr, Hp, Wp)
    corr = corr[:, pad:-pad, pad:-pad]                             # (R,H,W)

    if softmax:
        flat = corr.reshape(-1)
        corr = pallas_global_softmax(flat).reshape(n_rotations, H, W)
    return corr


# --------------------------------- main -------------------------------------

if __name__ == "__main__":
    in_shape = (16, 16, 4)     # (H, W, C) — small synthetic config
    n_rotations = 4
    crop_size = 8
    output_dim = kernel_dim = 3

    key = jax.random.PRNGKey(0)
    k_img, k_par = jax.random.split(key)
    inp_img = jax.random.normal(k_img, in_shape, jnp.float32)
    p = (7, 9)                 # pick pixel, as in the torch forward
    params = init_params(k_par, in_shape[2], output_dim, kernel_dim)

    out = two_stream_transport_forward(inp_img, p, params,
                                       n_rotations=n_rotations,
                                       crop_size=crop_size,
                                       softmax=True)
    out = jax.block_until_ready(out)

    assert out.shape == (n_rotations, in_shape[0], in_shape[1]), out.shape
    assert bool(jnp.isfinite(out).all())
    assert abs(float(out.sum()) - 1.0) < 1e-3   # global softmax normalization
    print("KERNEL_OK")
</pallas_src>

<mosaic_0001>
module attributes {stable_mosaic.version = 11 : i64} {
  func.func @_proj_kernel(%arg0: i32, %arg1: memref<256x4xf32, #tpu.memory_space<vmem>>, %arg2: memref<4x128xf32, #tpu.memory_space<vmem>>, %arg3: memref<1x128xf32, #tpu.memory_space<vmem>>, %arg4: memref<256x128xf32, #tpu.memory_space<vmem>>) attributes {dimension_semantics = [#tpu.dimension_semantics<parallel>], iteration_bounds = array<i64: 4>, scalar_prefetch = 0 : i64, scratch_operands = 0 : i64, tpu.core_type = #tpu.core_type<tc>, window_params = [{transform_indices = @transform_0, window_bounds = array<i64: 256, 4>}, {pipeline_mode = #tpu.pipeline_mode<synchronous>, transform_indices = @transform_1, window_bounds = array<i64: 4, 128>}, {pipeline_mode = #tpu.pipeline_mode<synchronous>, transform_indices = @transform_2, window_bounds = array<i64: 1, 128>}, {transform_indices = @transform_3, window_bounds = array<i64: 256, 128>}]} {
    %c0 = arith.constant 0 : index
    %c0_0 = arith.constant 0 : index
    %0 = vector.load %arg1[%c0, %c0_0] : memref<256x4xf32, #tpu.memory_space<vmem>>, vector<256x4xf32>
    %c0_1 = arith.constant 0 : index
    %c0_2 = arith.constant 0 : index
    %1 = vector.load %arg2[%c0_1, %c0_2] : memref<4x128xf32, #tpu.memory_space<vmem>>, vector<4x128xf32>
    %cst = arith.constant dense<0.000000e+00> : vector<256x128xf32>
    %2 = tpu.matmul %0, %1, %cst {dimension_numbers = #tpu.dot_dimension_numbers<[1], [0], [0], [1], [0, 0, 1, 1], [], []>} : vector<256x4xf32>, vector<4x128xf32>, vector<256x128xf32> -> vector<256x128xf32>
    %c0_3 = arith.constant 0 : index
    %c0_4 = arith.constant 0 : index
    %3 = vector.load %arg3[%c0_3, %c0_4] : memref<1x128xf32, #tpu.memory_space<vmem>>, vector<1x128xf32>
    %4 = vector.broadcast %3 : vector<1x128xf32> to vector<256x128xf32>
    %5 = arith.addf %2, %4 : vector<256x128xf32>
    %c0_5 = arith.constant 0 : index
    %c0_6 = arith.constant 0 : index
    %6 = vector.load %arg4[%c0_5, %c0_6] : memref<256x128xf32, #tpu.memory_space<vmem>>, vector<256x128xf32>
    tpu.vector_store %arg4[%c0_5, %c0_6], %5 {strides = array<i32>} : memref<256x128xf32, #tpu.memory_space<vmem>>, vector<256x128xf32>,
    return
  }
  func.func @transform_0(%arg0: i32) -> (i32, i32) {
    %c0_i32 = arith.constant 0 : i32
    %c0_i32_0 = arith.constant 0 : i32
    return %arg0, %c0_i32 : i32, i32
  }
  func.func @transform_1(%arg0: i32) -> (i32, i32) {
    %c0_i32 = arith.constant 0 : i32
    %c0_i32_0 = arith.constant 0 : i32
    %c0_i32_1 = arith.constant 0 : i32
    return %c0_i32, %c0_i32_0 : i32, i32
  }
  func.func @transform_2(%arg0: i32) -> (i32, i32) {
    %c0_i32 = arith.constant 0 : i32
    %c0_i32_0 = arith.constant 0 : i32
    %c0_i32_1 = arith.constant 0 : i32
    return %c0_i32, %c0_i32_0 : i32, i32
  }
  func.func @transform_3(%arg0: i32) -> (i32, i32) {
    %c0_i32 = arith.constant 0 : i32
    %c0_i32_0 = arith.constant 0 : i32
    return %arg0, %c0_i32 : i32, i32
  }
}

</mosaic_0001>

<bundles_post_ra>
// kernel: tpu_custom_call.1
= control target key start
LH: loop header
LB: loop body
LE: loop exit
PB: predicated region body
PF: predicated region fallthrough
CT: control target
= control target key end

     0   :  { %8 = vsyncpa [#allocation3], 0  ;;  %s1201_s0 = inlined_call_operand.vmem [shape: f32[832,4], index: 0, kind: input, shape index: {}]   ;;  %s1202_s1 = inlined_call_operand.vmem [shape: f32[4,128], index: 1, kind: input, shape index: {}]   ;;  %s1203_s2 = inlined_call_operand.vmem [shape: f32[1,128], index: 2, kind: input, shape index: {}]   ;;  %s1204_s3 = inlined_call_operand.hbm [shape: f32[832,128], index: 3, kind: output, shape index: {}]  }
   0x1   :  { %10 = vsyncpa [#allocation3 + $0x1], 0  ;;  %s939_s12 = smov 0   ;;  %s941_s13 = smov 0  }
   0x2   :  { %s943_s14 = smov 0   ;;  %s945_s15 = smov 0  }
   0x3 LB: > { %s960_s16 = sadd.s32 4294967295, %s914_s15   ;;  %s676_s17 = sadd.s32 4294967294, %s914_s15   ;;  %s914_s15 = sphi %s945_s15, %s1210_s15   ;;  %s910_s14 = sphi %s943_s14, %s1209_s14   ;;  %s906_s13 = sphi %s941_s13, %s1208_s13   ;;  %s902_s12 = sphi %s939_s12, %s1207_s12  }
   0x4   : > { %s964_s18 = sadd.s32 1, %s914_s15   ;;  %s91_s19 = sadd.s32 1, %s910_s14 }
   0x5   : > { %s88_s20 = ssub.s32 %s914_s15, %s964_s18  ;;  %p101_p0 = scmp.ne.s32.totalorder %s910_s14, %s906_s13 }
   0x6   : > { %p89_p1 = scmp.eq.s32.totalorder %s88_s20, 0  ;;  %p102_p2 = scmp.eq.s32.totalorder %s960_s16, 3 }
   0x7   : > { %p107_p3 = scmp.ne.s32.totalorder %s906_s13, %s902_s12  ;;  %p108_p4 = scmp.eq.s32.totalorder %s676_s17, 3 }
   0x8   : > { %s975_s21 = scalar_select %p89_p1, %s910_s14, %s91_s19  }
   0x9   : > { %p977_p5 = por %p102_p2, %p101_p0  ;;  %p981_p6 = por %p108_p4, %p107_p3 }
   0xa   : > { %p679_p7 = scmp.ge.s32.totalorder %s914_s15, 1  ;;  %p149_p8 = scmp.lt.s32.totalorder %s914_s15, 5 }
   0xc   : > { %p150_p9 = pnand %p679_p7, %p149_p8 }
   0xd   : > { %v228_v0 = vld [vmem:[%s1202_s1] sm:$0xf] (!%p150_p9)  ;;  %vm333_vm0 = vcmask (!%p150_p9), 1043456   ;;  %s991_s26 = sshll.u32 (!%p150_p9), %s960_s16, 5  ;;  %vm236_vm1 = vcmask (!%p150_p9), 31744   ;;  %s174_s5 = sand.u32 (!%p150_p9), 1, %s906_s13  }
   0xe   : > { %153 = sbr.rel (%p150_p9) target bundleno = 300 (0x12c), region = 32  ;;  %760 = vmatprep.subr.msk.mxu0 (!%p150_p9), %vm333_vm0, %v228_v0  ;;  %810 = vmatprep.subr.msk.mxu1 (!%p150_p9), %vm333_vm0, %v228_v0  ;;  %p182_p10 = scmp.lt.s32.totalorder (!%p150_p9), %s991_s26, 103  ;;  %v1070_v33 = vld [vmem:[%s1203_s2] ss:$0 sm:$0xff] (!%p150_p9) }
   0xf   : > { %761 = vmatpush3.msk.msra.mxu0 (!%p150_p9), %vm333_vm0, %v228_v0  ;;  %811 = vmatpush3.msk.msra.mxu1 (!%p150_p9), %vm333_vm0, %v228_v0  ;;  %s680_s6 = sshll.u32 (!%p150_p9), %s174_s5, 8  ;;  %s1140_s10 = scalar_lea.sflag (!%p150_p9), [#allocation3], %s174_s5 }
  0x10   : > { %s1076_s9 = scalar_lea.vmem (!%p150_p9), [#allocation2], %s680_s6 }
  0x15   : > { %s183_s27 = scalar_select %p182_p10, %s991_s26, 103 }
  0x16   : > { %s603_s11 = ssub.s32 (%p977_p5), 104, %s991_s26 }
  0x17   : > { %s682_s28 = sshll.u32 %s183_s27, 3  ;;  %p604_p11 = scmp.lt.s32.totalorder (%p977_p5), %s603_s11, 32 }
  0x18   : > { %s998_s4 = scalar_lea.vmem %s1201_s0, %s682_s28 }
  0x19   : > { %v196_v1 = vld [vmem:[%s998_s4] sm:$0xff]  ;;  %v197_v3 = vld [vmem:[%s998_s4 + $0x8] sm:$0xff]  ;;  %v198_v5 = vld [vmem:[%s998_s4 + $0x10] sm:$0xff] }
  0x1a   : > { %v212_v2 = vld [vmem:[%s998_s4 + $0x80] sm:$0xff]  ;;  %762 = vmatprep.mubr.msk.f32.mxu0 %vm236_vm1, %v196_v1  ;;  %v213_v4 = vld [vmem:[%s998_s4 + $0x88] sm:$0xff]  ;;  %v214_v6 = vld [vmem:[%s998_s4 + $0x90] sm:$0xff] }
  0x1b   : > { %786 = vmatprep.mubr.msk.f32.mxu1 %vm236_vm1, %v212_v2  ;;  %763 = vmatmul.mubr.msk.f32.vlgmr.msra.gmra.mrb[0].mxu0 %vm236_vm1, %v197_v3  ;;  %v199_v7 = vld [vmem:[%s998_s4 + $0x18] sm:$0xff]  ;;  %v200_v9 = vld [vmem:[%s998_s4 + $0x20] sm:$0xff]  ;;  %v201_v11 = vld [vmem:[%s998_s4 + $0x28] sm:$0xff] }
  0x1c   : > { %787 = vmatmul.mubr.msk.f32.vlgmr.msra.gmra.mrb[0].mxu1 %vm236_vm1, %v213_v4  ;;  %765 = vmatprep.mubr.msk.f32.mxu0 %vm236_vm1, %v198_v5  ;;  %v215_v8 = vld [vmem:[%s998_s4 + $0x98] sm:$0xff]  ;;  %v216_v10 = vld [vmem:[%s998_s4 + $0xa0] sm:$0xff]  ;;  %v217_v12 = vld [vmem:[%s998_s4 + $0xa8] sm:$0xff] }
  0x1d   : > { %789 = vmatprep.mubr.msk.f32.mxu1 %vm236_vm1, %v214_v6  ;;  %v202_v13 = vld [vmem:[%s998_s4 + $0x30] sm:$0xff]  ;;  %v203_v15 = vld [vmem:[%s998_s4 + $0x38] sm:$0xff]  ;;  %v204_v17 = vld [vmem:[%s998_s4 + $0x40] sm:$0xff] }
  0x1e   : > { %v218_v14 = vld [vmem:[%s998_s4 + $0xb0] sm:$0xff]  ;;  %v219_v16 = vld [vmem:[%s998_s4 + $0xb8] sm:$0xff]  ;;  %v220_v18 = vld [vmem:[%s998_s4 + $0xc0] sm:$0xff] }
  0x1f   : > { %766 = vmatmul.mubr.msk.f32.gmra.mrb[2].mxu0 %vm236_vm1, %v199_v7  ;;  %v205_v19 = vld [vmem:[%s998_s4 + $0x48] sm:$0xff]  ;;  %v206_v21 = vld [vmem:[%s998_s4 + $0x50] sm:$0xff]  ;;  %v207_v23 = vld [vmem:[%s998_s4 + $0x58] sm:$0xff] }
  0x20   : > { %790 = vmatmul.mubr.msk.f32.gmra.mrb[2].mxu1 %vm236_vm1, %v215_v8  ;;  %768 = vmatprep.mubr.msk.f32.mxu0 %vm236_vm1, %v200_v9  ;;  %v221_v20 = vld [vmem:[%s998_s4 + $0xc8] sm:$0xff]  ;;  %v222_v22 = vld [vmem:[%s998_s4 + $0xd0] sm:$0xff]  ;;  %v223_v24 = vld [vmem:[%s998_s4 + $0xd8] sm:$0xff] }
  0x21   : > { %792 = vmatprep.mubr.msk.f32.mxu1 %vm236_vm1, %v216_v10  ;;  %v208_v25 = vld [vmem:[%s998_s4 + $0x60] sm:$0xff]  ;;  %v209_v27 = vld [vmem:[%s998_s4 + $0x68] sm:$0xff]  ;;  %v210_v29 = vld [vmem:[%s998_s4 + $0x70] sm:$0xff] }
  0x22   : > { %v224_v26 = vld [vmem:[%s998_s4 + $0xe0] sm:$0xff]  ;;  %v225_v28 = vld [vmem:[%s998_s4 + $0xe8] sm:$0xff]  ;;  %v226_v30 = vld [vmem:[%s998_s4 + $0xf0] sm:$0xff] }
  0x23   : > { %769 = vmatmul.mubr.msk.f32.gmra.mrb[4].mxu0 %vm236_vm1, %v201_v11  ;;  %v211_v31 = vld [vmem:[%s998_s4 + $0x78] sm:$0xff] }
  0x24   : > { %793 = vmatmul.mubr.msk.f32.gmra.mrb[4].mxu1 %vm236_vm1, %v217_v12  ;;  %771 = vmatprep.mubr.msk.f32.mxu0 %vm236_vm1, %v202_v13  ;;  %v227_v32 = vld [vmem:[%s998_s4 + $0xf8] sm:$0xff] }
  0x25   : > { %795 = vmatprep.mubr.msk.f32.mxu1 %vm236_vm1, %v218_v14 }
  0x27   : > { %772 = vmatmul.mubr.msk.f32.gmra.mrb[6].mxu0 %vm236_vm1, %v203_v15 }
  0x28   : > { %796 = vmatmul.mubr.msk.f32.gmra.mrb[6].mxu1 %vm236_vm1, %v219_v16  ;;  %774 = vmatprep.mubr.msk.f32.mxu0 %vm236_vm1, %v204_v17 }
  0x29   : > { %798 = vmatprep.mubr.msk.f32.mxu1 %vm236_vm1, %v220_v18 }
  0x2b   : > { %775 = vmatmul.mubr.msk.f32.gmra.mrb[8].mxu0 %vm236_vm1, %v205_v19 }
  0x2c   : > { %799 = vmatmul.mubr.msk.f32.gmra.mrb[8].mxu1 %vm236_vm1, %v221_v20  ;;  %777 = vmatprep.mubr.msk.f32.mxu0 %vm236_vm1, %v206_v21 }
  0x2d   : > { %801 = vmatprep.mubr.msk.f32.mxu1 %vm236_vm1, %v222_v22 }
  0x2f   : > { %778 = vmatmul.mubr.msk.f32.gmra.mrb[10].mxu0 %vm236_vm1, %v207_v23 }
  0x30   : > { %802 = vmatmul.mubr.msk.f32.gmra.mrb[10].mxu1 %vm236_vm1, %v223_v24  ;;  %780 = vmatprep.mubr.msk.f32.mxu0 %vm236_vm1, %v208_v25 }
  0x31   : > { %804 = vmatprep.mubr.msk.f32.mxu1 %vm236_vm1, %v224_v26 }
  0x33   : > { %781 = vmatmul.mubr.msk.f32.gmra.mrb[12].mxu0 %vm236_vm1, %v209_v27 }
  0x34   : > { %805 = vmatmul.mubr.msk.f32.gmra.mrb[12].mxu1 %vm236_vm1, %v225_v28  ;;  %783 = vmatprep.mubr.msk.f32.mxu0 %vm236_vm1, %v210_v29 }
  0x35   : > { %807 = vmatprep.mubr.msk.f32.mxu1 %vm236_vm1, %v226_v30 }
  0x37   : > { %784 = vmatmul.mubr.msk.f32.gmra.mrb[14].mxu0 %vm236_vm1, %v211_v31 }
  0x38   : > { %808 = vmatmul.mubr.msk.f32.gmra.mrb[14].mxu1 %vm236_vm1, %v227_v32 }
  0xee   : > { %v764_v34 = vpop.f32.mrb[0].mxu0 }
  0xef   : > { %v788_v35 = vpop.f32.mrb[0].mxu1  ;;  %v409_v36 = vadd.f32 %v764_v34, %v1070_v33  ;;  %v403_v38 = vpop.f32.mrb[1].mxu0 }
  0xf0   : > { %v489_v37 = vadd.f32 %v788_v35, %v1070_v33  ;;  %v483_v39 = vpop.f32.mrb[1].mxu1  ;;  %v404_v40 = vadd.f32 %v1070_v33, %v403_v38 }
  0xf1   : > { %v484_v41 = vadd.f32 %v1070_v33, %v483_v39  ;;  %563 = vst [vmem:[%s1076_s9 + $0x8] sm:$0xff] %v409_v36 }
  0xf2   : > { %579 = vst [vmem:[%s1076_s9 + $0x88] sm:$0xff] %v489_v37  ;;  %562 = vst [vmem:[%s1076_s9] sm:$0xff] %v404_v40  ;;  %v767_v42 = vpop.f32.mrb[2].mxu0 }
  0xf3   : > { %578 = vst [vmem:[%s1076_s9 + $0x80] sm:$0xff] %v484_v41  ;;  %v791_v43 = vpop.f32.mrb[2].mxu1  ;;  %v419_v44 = vadd.f32 %v767_v42, %v1070_v33  ;;  %v413_v46 = vpop.f32.mrb[3].mxu0 }
  0xf4   : > { %v499_v45 = vadd.f32 %v791_v43, %v1070_v33  ;;  %v493_v47 = vpop.f32.mrb[3].mxu1  ;;  %v414_v48 = vadd.f32 %v1070_v33, %v413_v46 }
  0xf5   : > { %v494_v49 = vadd.f32 %v1070_v33, %v493_v47  ;;  %565 = vst [vmem:[%s1076_s9 + $0x18] sm:$0xff] %v419_v44 }
  0xf6   : > { %581 = vst [vmem:[%s1076_s9 + $0x98] sm:$0xff] %v499_v45  ;;  %564 = vst [vmem:[%s1076_s9 + $0x10] sm:$0xff] %v414_v48  ;;  %v770_v50 = vpop.f32.mrb[4].mxu0 }
  0xf7   : > { %580 = vst [vmem:[%s1076_s9 + $0x90] sm:$0xff] %v494_v49  ;;  %v794_v51 = vpop.f32.mrb[4].mxu1  ;;  %v429_v52 = vadd.f32 %v770_v50, %v1070_v33  ;;  %v423_v54 = vpop.f32.mrb[5].mxu0 }
  0xf8   : > { %v509_v53 = vadd.f32 %v794_v51, %v1070_v33  ;;  %v503_v55 = vpop.f32.mrb[5].mxu1  ;;  %v424_v56 = vadd.f32 %v1070_v33, %v423_v54 }
  0xf9   : > { %v504_v57 = vadd.f32 %v1070_v33, %v503_v55  ;;  %567 = vst [vmem:[%s1076_s9 + $0x28] sm:$0xff] %v429_v52 }
  0xfa   : > { %583 = vst [vmem:[%s1076_s9 + $0xa8] sm:$0xff] %v509_v53  ;;  %566 = vst [vmem:[%s1076_s9 + $0x20] sm:$0xff] %v424_v56  ;;  %v773_v58 = vpop.f32.mrb[6].mxu0 }
  0xfb   : > { %582 = vst [vmem:[%s1076_s9 + $0xa0] sm:$0xff] %v504_v57  ;;  %v797_v59 = vpop.f32.mrb[6].mxu1  ;;  %v439_v60 = vadd.f32 %v773_v58, %v1070_v33  ;;  %v433_v62 = vpop.f32.mrb[7].mxu0 }
  0xfc   : > { %v519_v61 = vadd.f32 %v797_v59, %v1070_v33  ;;  %v513_v63 = vpop.f32.mrb[7].mxu1  ;;  %v434_v0 = vadd.f32 %v1070_v33, %v433_v62 }
  0xfd   : > { %v514_v1 = vadd.f32 %v1070_v33, %v513_v63  ;;  %569 = vst [vmem:[%s1076_s9 + $0x38] sm:$0xff] %v439_v60 }
  0xfe   : > { %585 = vst [vmem:[%s1076_s9 + $0xb8] sm:$0xff] %v519_v61  ;;  %568 = vst [vmem:[%s1076_s9 + $0x30] sm:$0xff] %v434_v0  ;;  %v776_v2 = vpop.f32.mrb[8].mxu0 }
  0xff   : > { %584 = vst [vmem:[%s1076_s9 + $0xb0] sm:$0xff] %v514_v1  ;;  %v800_v3 = vpop.f32.mrb[8].mxu1  ;;  %v449_v4 = vadd.f32 %v776_v2, %v1070_v33  ;;  %v443_v6 = vpop.f32.mrb[9].mxu0 }
 0x100   : > { %v529_v5 = vadd.f32 %v800_v3, %v1070_v33  ;;  %v523_v7 = vpop.f32.mrb[9].mxu1  ;;  %v444_v8 = vadd.f32 %v1070_v33, %v443_v6 }
 0x101   : > { %v524_v9 = vadd.f32 %v1070_v33, %v523_v7  ;;  %571 = vst [vmem:[%s1076_s9 + $0x48] sm:$0xff] %v449_v4 }
 0x102   : > { %587 = vst [vmem:[%s1076_s9 + $0xc8] sm:$0xff] %v529_v5  ;;  %570 = vst [vmem:[%s1076_s9 + $0x40] sm:$0xff] %v444_v8  ;;  %v779_v10 = vpop.f32.mrb[10].mxu0 }
 0x103   : > { %586 = vst [vmem:[%s1076_s9 + $0xc0] sm:$0xff] %v524_v9  ;;  %v803_v11 = vpop.f32.mrb[10].mxu1  ;;  %v459_v12 = vadd.f32 %v779_v10, %v1070_v33  ;;  %v453_v14 = vpop.f32.mrb[11].mxu0 }
 0x104   : > { %v539_v13 = vadd.f32 %v803_v11, %v1070_v33  ;;  %v533_v15 = vpop.f32.mrb[11].mxu1  ;;  %v454_v16 = vadd.f32 %v1070_v33, %v453_v14 }
 0x105   : > { %v534_v17 = vadd.f32 %v1070_v33, %v533_v15  ;;  %573 = vst [vmem:[%s1076_s9 + $0x58] sm:$0xff] %v459_v12 }
 0x106   : > { %589 = vst [vmem:[%s1076_s9 + $0xd8] sm:$0xff] %v539_v13  ;;  %572 = vst [vmem:[%s1076_s9 + $0x50] sm:$0xff] %v454_v16  ;;  %v782_v18 = vpop.f32.mrb[12].mxu0 }
 0x107   : > { %588 = vst [vmem:[%s1076_s9 + $0xd0] sm:$0xff] %v534_v17  ;;  %v806_v19 = vpop.f32.mrb[12].mxu1  ;;  %v469_v20 = vadd.f32 %v782_v18, %v1070_v33  ;;  %v463_v22 = vpop.f32.mrb[13].mxu0 }
 0x108   : > { %v549_v21 = vadd.f32 %v806_v19, %v1070_v33  ;;  %v543_v23 = vpop.f32.mrb[13].mxu1  ;;  %v464_v24 = vadd.f32 %v1070_v33, %v463_v22 }
 0x109   : > { %v544_v25 = vadd.f32 %v1070_v33, %v543_v23  ;;  %575 = vst [vmem:[%s1076_s9 + $0x68] sm:$0xff] %v469_v20  ;;  %601 = sbr.rel (!%p977_p5) target bundleno = 300 (0x12c), region = 36 }
 0x10a   : > { %591 = vst [vmem:[%s1076_s9 + $0xe8] sm:$0xff] %v549_v21  ;;  %574 = vst [vmem:[%s1076_s9 + $0x60] sm:$0xff] %v464_v24  ;;  %v785_v26 = vpop.f32.mrb[14].mxu0 }
 0x10b   : > { %590 = vst [vmem:[%s1076_s9 + $0xe0] sm:$0xff] %v544_v25  ;;  %v809_v27 = vpop.f32.mrb[14].mxu1  ;;  %v479_v28 = vadd.f32 %v785_v26, %v1070_v33  ;;  %v473_v30 = vpop.f32.mrb[15].mxu0 }
 0x10c   : > { %v559_v29 = vadd.f32 %v809_v27, %v1070_v33  ;;  %v553_v31 = vpop.f32.mrb[15].mxu1  ;;  %v474_v32 = vadd.f32 %v1070_v33, %v473_v30 }
 0x10d   : > { %v554_v34 = vadd.f32 %v1070_v33, %v553_v31  ;;  %577 = vst [vmem:[%s1076_s9 + $0x78] sm:$0xff] %v479_v28 }
 0x10e   : > { %593 = vst [vmem:[%s1076_s9 + $0xf8] sm:$0xff] %v559_v29  ;;  %576 = vst [vmem:[%s1076_s9 + $0x70] sm:$0xff] %v474_v32 }
 0x10f   : > { %592 = vst [vmem:[%s1076_s9 + $0xf0] sm:$0xff] %v554_v34 }
 0x110   : > { %s1212_s11 = smov (!%p604_p11, %s603_s11), 32 }
 0x111   : > { %s1145_s17 = sshll.u32 %s1212_s11, 7 }
 0x112   : > { %s608_s19 = ssub.s32 4096, %s1145_s17 }
 0x113   : > { %609 = vsyncadd %s1140_s10, %s608_s19  ;;  %p720_p12 = scmp.ne.s32.totalorder %s1145_s17, 0  ;;  %s726_s20 = sshll.u32 %s960_s16, 12 }
 0x114   : > { %s1154_s25 = scalar_lea.hbm %s1204_s3, %s726_s20  ;;  %s614_s26 = sshll.u32 %s1076_s9, 4  ;;  %s1157_s26 = int_to_ptr.vmem [resolvable:$true] %s614_s26 }
 0x115   : > { %s852_s27 = scalar_lea.vmem %s1157_s26, %s1145_s17  ;;  %s916_s28 = smov [#allocation2]  }
 0x116   : > { %p853_p13 = scmp.ne.s32.totalorder %s1157_s26, %s852_s27  ;;  %s856_s29 = sshll.u32 %s916_s28, 4  ;;  %s857_s29 = int_to_ptr.vmem [resolvable:$false] %s856_s29 }
 0x117   : > { %s858_s16 = scalar_lea.vmem %s857_s29, 8192  ;;  %p859_p2 = scmp.lt.s32.totalorder %s1157_s26, %s857_s29 }
 0x118   : > { %p854_p0 = pnand %p853_p13, %p720_p12  ;;  %p860_p3 = scmp.lt.s32.totalorder %s858_s16, %s852_s27 }
 0x11a   : > { %p855_p1 = pneg %p854_p0  ;;  %p861_p4 = por %p860_p3, %p859_p2 }
 0x11c   : > { %p862_p5 = pnand %p861_p4, %p855_p1 }
 0x11e   : > { %865 = shalt.err (!%p862_p5)
}
 0x11f   : > { %s866_s30 = scalar_lea.hbm %s1154_s25, %s1145_s17  ;;  %s870_s6 = scalar_lea.hbm %s1204_s3, 13312 }
 0x120   : > { %p867_p7 = scmp.ne.s32.totalorder %s1154_s25, %s866_s30  ;;  %p871_p10 = scmp.lt.u32.totalorder %s1154_s25, %s1204_s3 }
 0x121   : > { %p872_p11 = scmp.lt.u32.totalorder %s870_s6, %s866_s30  ;;  %p874_p0 = scmp.lt.u32.totalorder %s866_s30, %s1154_s25 }
 0x122   : > { %p868_p8 = pnand %p867_p7, %p720_p12 }
 0x123   : > { %p873_p13 = por %p872_p11, %p871_p10 }
 0x124   : > { %p869_p9 = pneg %p868_p8 }
 0x125   : > { %p875_p1 = por %p874_p0, %p873_p13 }
 0x127   : > { %p876_p2 = pnand %p875_p1, %p869_p9 }
 0x129   : > { %879 = shalt.err (!%p876_p2)
}
 0x12a   : > { %s917_s9 = smov 128   ;;  %s918_s11 = smov 8  }
 0x12b   : > { %620 = dma.vmem_to_hbm [thread:$0]  (%p720_p12), %s1157_s26, %s1145_s17, %s1154_s25, %s1140_s10, %s917_s9, %s917_s9, %s918_s11  }
 0x12c PF: > { %p817_p3 = scmp.ge.s32.totalorder %s914_s15, 2  ;;  %s629_s19 = sand.u32 1, %s902_s12  }
 0x12d   : > { %s630_s20 = scalar_lea.sflag [#allocation3], %s629_s19 }
 0x12e   : > { %p814_p4 = pnand %p817_p3, %p981_p6 }
 0x130   : > { %897 = dma.done.wait (!%p814_p4), %s630_s20, 4096  }
 0x131   : > { %899 = vsyncadd (!%p814_p4), %s630_s20, 4294963200  ;;  %p13_p5 = scmp.ge.s32.totalorder %s964_s18, 6   ;;  %s1207_s12 = smov %s906_s13 }
 0x132   : > { %s1208_s13 = smov %s910_s14  ;;  %s1209_s14 = smov %s975_s21 }
 0x133   : > { %s1210_s15 = smov %s964_s18  ;;  %15 = sbr.rel (!%p13_p5) target bundleno = 3 (0x3), region = 67 }
 0x13a   :  { %635 = vsyncpa [#allocation3], 1 }
 0x13b   :  { %637 = vsyncpa [#allocation3 + $0x1], 1 }

</bundles_post_ra>
